<compile_context>
chip_gen: v7x
topology: tpu7x:2x2x1
jax: 0.10.0
libtpu: 0.0.40
codegen_flags: <defaults>
</compile_context>

<pallas_src>
import functools

import jax
import jax.numpy as jnp
from jax import lax
from jax.experimental import pallas as pl
from jax.experimental.pallas import tpu as pltpu

MASK_VALUE = 1e30


def _single_class_loss_kernel(span_s_ref, span_e_ref, start_ref, end_ref, mask_ref,
                              out_ref, *, batch_size, neg_inv_b):
    tb, s = start_ref.shape

    @pl.when(pl.program_id(0) == 0)
    def _():
        out_ref[0, 0] = 0.0

    # Cast to f32 right after load (v5e VPU/EUP have no bf16; 1e30 must stay in f32).
    spans = jnp.concatenate(
        [span_s_ref[...].astype(jnp.float32), span_e_ref[...].astype(jnp.float32)], axis=0)
    logits = jnp.concatenate(
        [start_ref[...].astype(jnp.float32), end_ref[...].astype(jnp.float32)], axis=0)
    mask_f = mask_ref[...].astype(jnp.float32)
    mask2 = jnp.concatenate([mask_f, mask_f], axis=0)              # (2*tb, S)

    # Shared column iota for both the argmax and the one-hot gather.
    col = lax.broadcasted_iota(jnp.int32, (2 * tb, s), 1)

    # First-occurrence argmax along the sequence axis (matches torch argmax tie-breaking).
    mx = jnp.max(spans, axis=1, keepdims=True)                     # (2*tb, 1)
    targets = jnp.min(jnp.where(spans == mx, col, s), axis=1, keepdims=True)

    # Gather logit and mask at the target column; apply the mask only to the gathered element.
    onehot = col == targets                                        # (2*tb, S)
    picked_logit = jnp.sum(jnp.where(onehot, logits, 0.0), axis=1, keepdims=True)
    picked_mask = jnp.sum(jnp.where(onehot, mask2, 0.0), axis=1, keepdims=True)
    picked = picked_logit - (1.0 - picked_mask) * MASK_VALUE       # (2*tb, 1)

    # Zero out padded rows of the last batch tile (when B % block_b != 0).
    row = pl.program_id(0) * tb + lax.broadcasted_iota(jnp.int32, (tb, 1), 0)
    valid = jnp.concatenate([row, row], axis=0) < batch_size
    partial = jnp.sum(jnp.where(valid, picked, 0.0))

    # start_loss + end_loss == -(sum over all 2*B picked values) / B.
    out_ref[0, 0] += partial * neg_inv_b


def single_class_loss_evaluator(answer_span_starts, answer_span_ends,
                                start_logits, end_logits, context_mask,
                                *, block_b=None):
    """Pallas wrapper. All inputs are (B, S) in their native dtypes; returns a f32 scalar."""
    B, S = start_logits.shape
    if block_b is None:
        # Full batch when small; 512-row tiles otherwise (f32-equivalent working set stays
        # well inside v7x's 32 MiB scoped-VMEM default even for S in the low thousands;
        # v5e/v6e could take larger tiles, but 512 already amortizes the per-step overhead).
        block_b = B if B <= 512 else 512
    assert block_b == B or block_b % 8 == 0, "block_b must equal B or be a multiple of 8"

    grid = (pl.cdiv(B, block_b),)
    tile = pl.BlockSpec((block_b, S), lambda b: (b, 0))
    kernel = functools.partial(_single_class_loss_kernel,
                               batch_size=B, neg_inv_b=-1.0 / B)

    out = pl.pallas_call(
        kernel,
        out_shape=jax.ShapeDtypeStruct((1, 1), jnp.float32),
        grid=grid,
        in_specs=[tile] * 5,
        out_specs=pl.BlockSpec(memory_space=pltpu.MemorySpace.SMEM),
        compiler_params=pltpu.CompilerParams(
            dimension_semantics=("arbitrary",)),  # scalar accumulation across batch tiles
    )(answer_span_starts, answer_span_ends, start_logits, end_logits, context_mask)
    return out[0, 0]


def _reference(answer_span_starts, answer_span_ends, start_logits, end_logits, context_mask):
    """Pure-JAX reference mirroring the PyTorch module (f32 math)."""
    sl = start_logits.astype(jnp.float32)
    el = end_logits.astype(jnp.float32)
    m = context_mask.astype(jnp.float32)
    starts = jnp.argmax(answer_span_starts, axis=1)
    ends = jnp.argmax(answer_span_ends, axis=1)
    ms = sl - (1.0 - m) * MASK_VALUE
    me = el - (1.0 - m) * MASK_VALUE
    b = jnp.arange(sl.shape[0])
    return -jnp.mean(ms[b, starts]) - jnp.mean(me[b, ends])


if __name__ == "__main__":
    B, S = 4, 128  # batch, context sequence length
    key = jax.random.PRNGKey(0)
    k1, k2, k3, k4 = jax.random.split(key, 4)

    # LogSoftmax'ed logits, stored in bf16 (native dtype) as a model would emit them.
    start_logits = jax.nn.log_softmax(
        jax.random.normal(k1, (B, S), jnp.float32), axis=1).astype(jnp.bfloat16)
    end_logits = jax.nn.log_softmax(
        jax.random.normal(k2, (B, S), jnp.float32), axis=1).astype(jnp.bfloat16)

    # context_mask: valid prefix of varying lengths per row, kept as int8.
    ctx_lens = jnp.array([S, S - 16, S - 32, S - 64], dtype=jnp.int32)
    context_mask = (jnp.arange(S)[None, :] < ctx_lens[:, None]).astype(jnp.int8)

    # answer spans as int8 one-hot rows, located inside the unmasked region.
    start_idx = jax.random.randint(k3, (B,), 0, S - 64)
    end_idx = jnp.minimum(start_idx + jax.random.randint(k4, (B,), 0, 8), S - 65)
    answer_span_starts = jax.nn.one_hot(start_idx, S, dtype=jnp.int8)
    answer_span_ends = jax.nn.one_hot(end_idx, S, dtype=jnp.int8)

    loss = single_class_loss_evaluator(
        answer_span_starts, answer_span_ends, start_logits, end_logits, context_mask)
    loss = jax.block_until_ready(loss)

    ref = _reference(answer_span_starts, answer_span_ends,
                     start_logits, end_logits, context_mask)
    assert jnp.allclose(loss, ref, rtol=1e-4, atol=1e-4), (loss, ref)

    print("KERNEL_OK")
</pallas_src>

<mosaic_0001>
module attributes {stable_mosaic.version = 11 : i64} {
  func.func @_single_class_loss_kernel(%arg0: i32, %arg1: memref<4x128xi8, #tpu.memory_space<vmem>>, %arg2: memref<4x128xi8, #tpu.memory_space<vmem>>, %arg3: memref<4x128xbf16, #tpu.memory_space<vmem>>, %arg4: memref<4x128xbf16, #tpu.memory_space<vmem>>, %arg5: memref<4x128xi8, #tpu.memory_space<vmem>>, %arg6: memref<1x1xf32, #tpu.memory_space<smem>>) attributes {dimension_semantics = [#tpu.dimension_semantics<arbitrary>], iteration_bounds = array<i64: 1>, scalar_prefetch = 0 : i64, scratch_operands = 0 : i64, tpu.core_type = #tpu.core_type<tc>, window_params = [{transform_indices = @transform_0, window_bounds = array<i64: 4, 128>}, {transform_indices = @transform_1, window_bounds = array<i64: 4, 128>}, {transform_indices = @transform_2, window_bounds = array<i64: 4, 128>}, {transform_indices = @transform_3, window_bounds = array<i64: 4, 128>}, {transform_indices = @transform_4, window_bounds = array<i64: 4, 128>}, {transform_indices = @transform_5, window_bounds = array<i64: 1, 1>}]} {
    %c0_i32 = arith.constant 0 : i32
    %0 = arith.cmpi eq, %arg0, %c0_i32 : i32
    %1 = arith.extui %0 : i1 to i32
    %c0_i32_0 = arith.constant 0 : i32
    %2 = arith.cmpi ne, %1, %c0_i32_0 : i32
    scf.if %2 {
      %cst_25 = arith.constant 0.000000e+00 : f32
      %c0_26 = arith.constant 0 : index
      %c0_27 = arith.constant 0 : index
      %57 = memref.load %arg6[%c0_26, %c0_27] : memref<1x1xf32, #tpu.memory_space<smem>>
      memref.store %cst_25, %arg6[%c0_26, %c0_27] : memref<1x1xf32, #tpu.memory_space<smem>>
    } else {
    }
    %c0 = arith.constant 0 : index
    %c0_1 = arith.constant 0 : index
    %3 = vector.load %arg1[%c0, %c0_1] : memref<4x128xi8, #tpu.memory_space<vmem>>, vector<4x128xi8>
    %4 = arith.sitofp %3 : vector<4x128xi8> to vector<4x128xf32>
    %c0_2 = arith.constant 0 : index
    %c0_3 = arith.constant 0 : index
    %5 = vector.load %arg2[%c0_2, %c0_3] : memref<4x128xi8, #tpu.memory_space<vmem>>, vector<4x128xi8>
    %6 = arith.sitofp %5 : vector<4x128xi8> to vector<4x128xf32>
    %7 = tpu.concatenate %4, %6 in 0 : vector<4x128xf32>, vector<4x128xf32> -> vector<8x128xf32>
    %c0_4 = arith.constant 0 : index
    %c0_5 = arith.constant 0 : index
    %8 = vector.load %arg3[%c0_4, %c0_5] : memref<4x128xbf16, #tpu.memory_space<vmem>>, vector<4x128xbf16>
    %9 = arith.extf %8 : vector<4x128xbf16> to vector<4x128xf32>
    %c0_6 = arith.constant 0 : index
    %c0_7 = arith.constant 0 : index
    %10 = vector.load %arg4[%c0_6, %c0_7] : memref<4x128xbf16, #tpu.memory_space<vmem>>, vector<4x128xbf16>
    %11 = arith.extf %10 : vector<4x128xbf16> to vector<4x128xf32>
    %12 = tpu.concatenate %9, %11 in 0 : vector<4x128xf32>, vector<4x128xf32> -> vector<8x128xf32>
    %c0_8 = arith.constant 0 : index
    %c0_9 = arith.constant 0 : index
    %13 = vector.load %arg5[%c0_8, %c0_9] : memref<4x128xi8, #tpu.memory_space<vmem>>, vector<4x128xi8>
    %14 = arith.sitofp %13 : vector<4x128xi8> to vector<4x128xf32>
    %15 = tpu.concatenate %14, %14 in 0 : vector<4x128xf32>, vector<4x128xf32> -> vector<8x128xf32>
    %16 = tpu.iota {dimensions = array<i32: 1>} : vector<8x128xi32>
    %cst = arith.constant dense<0xFF800000> : vector<8xf32>
    %17 = vector.multi_reduction <maximumf>, %7, %cst [1] : vector<8x128xf32> to vector<8xf32>
    %18 = vector.shape_cast %17 : vector<8xf32> to vector<8x1xf32>
    %19 = vector.broadcast %18 : vector<8x1xf32> to vector<8x128xf32>
    %20 = arith.cmpf oeq, %7, %19 : vector<8x128xf32>
    %c128_i32 = arith.constant 128 : i32
    %21 = vector.broadcast %c128_i32 : i32 to vector<8x128xi32>
    %22 = arith.select %20, %16, %21 : vector<8x128xi1>, vector<8x128xi32>
    %cst_10 = arith.constant dense<2147483647> : vector<8xi32>
    %23 = vector.multi_reduction <minsi>, %22, %cst_10 [1] : vector<8x128xi32> to vector<8xi32>
    %24 = vector.shape_cast %23 : vector<8xi32> to vector<8x1xi32>
    %25 = vector.broadcast %24 : vector<8x1xi32> to vector<8x128xi32>
    %26 = arith.cmpi eq, %16, %25 : vector<8x128xi32>
    %cst_11 = arith.constant 0.000000e+00 : f32
    %27 = vector.broadcast %cst_11 : f32 to vector<8x128xf32>
    %28 = arith.select %26, %12, %27 : vector<8x128xi1>, vector<8x128xf32>
    %cst_12 = arith.constant dense<0.000000e+00> : vector<8xf32>
    %29 = vector.multi_reduction <add>, %28, %cst_12 [1] : vector<8x128xf32> to vector<8xf32>
    %30 = vector.shape_cast %29 : vector<8xf32> to vector<8x1xf32>
    %cst_13 = arith.constant 0.000000e+00 : f32
    %31 = vector.broadcast %cst_13 : f32 to vector<8x128xf32>
    %32 = arith.select %26, %15, %31 : vector<8x128xi1>, vector<8x128xf32>
    %cst_14 = arith.constant dense<0.000000e+00> : vector<8xf32>
    %33 = vector.multi_reduction <add>, %32, %cst_14 [1] : vector<8x128xf32> to vector<8xf32>
    %34 = vector.shape_cast %33 : vector<8xf32> to vector<8x1xf32>
    %cst_15 = arith.constant 1.000000e+00 : f32
    %35 = vector.broadcast %cst_15 : f32 to vector<8x1xf32>
    %36 = arith.subf %35, %34 : vector<8x1xf32>
    %cst_16 = arith.constant 1.000000e+30 : f32
    %37 = vector.broadcast %cst_16 : f32 to vector<8x1xf32>
    %38 = arith.mulf %36, %37 : vector<8x1xf32>
    %39 = arith.subf %30, %38 : vector<8x1xf32>
    %c4_i32 = arith.constant 4 : i32
    %40 = arith.muli %arg0, %c4_i32 : i32
    %41 = tpu.iota {dimensions = array<i32: 0>} : vector<4x1xi32>
    %42 = vector.broadcast %40 : i32 to vector<4x1xi32>
    %43 = arith.addi %42, %41 : vector<4x1xi32>
    %44 = tpu.concatenate %43, %43 in 0 : vector<4x1xi32>, vector<4x1xi32> -> vector<8x1xi32>
    %c4_i32_17 = arith.constant 4 : i32
    %45 = vector.broadcast %c4_i32_17 : i32 to vector<8x1xi32>
    %46 = arith.cmpi slt, %44, %45 : vector<8x1xi32>
    %cst_18 = arith.constant 0.000000e+00 : f32
    %47 = vector.broadcast %cst_18 : f32 to vector<8x1xf32>
    %48 = arith.select %46, %39, %47 : vector<8x1xi1>, vector<8x1xf32>
    %49 = vector.shape_cast %48 : vector<8x1xf32> to vector<1x8x1xf32>
    %cst_19 = arith.constant dense<0.000000e+00> : vector<1xf32>
    %50 = vector.multi_reduction <add>, %49, %cst_19 [1, 2] : vector<1x8x1xf32> to vector<1xf32>
    %51 = vector.shape_cast %50 : vector<1xf32> to vector<1x1x1xf32>
    %52 = vector.extract %51[0, 0, 0] : f32 from vector<1x1x1xf32>
    %c0_20 = arith.constant 0 : index
    %c0_21 = arith.constant 0 : index
    %53 = memref.load %arg6[%c0_20, %c0_21] : memref<1x1xf32, #tpu.memory_space<smem>>
    %cst_22 = arith.constant -2.500000e-01 : f32
    %54 = arith.mulf %52, %cst_22 : f32
    %55 = arith.addf %53, %54 : f32
    %c0_23 = arith.constant 0 : index
    %c0_24 = arith.constant 0 : index
    %56 = memref.load %arg6[%c0_23, %c0_24] : memref<1x1xf32, #tpu.memory_space<smem>>
    memref.store %55, %arg6[%c0_23, %c0_24] : memref<1x1xf32, #tpu.memory_space<smem>>
    return
  }
  func.func @transform_0(%arg0: i32) -> (i32, i32) {
    %c0_i32 = arith.constant 0 : i32
    %c0_i32_0 = arith.constant 0 : i32
    return %arg0, %c0_i32 : i32, i32
  }
  func.func @transform_1(%arg0: i32) -> (i32, i32) {
    %c0_i32 = arith.constant 0 : i32
    %c0_i32_0 = arith.constant 0 : i32
    return %arg0, %c0_i32 : i32, i32
  }
  func.func @transform_2(%arg0: i32) -> (i32, i32) {
    %c0_i32 = arith.constant 0 : i32
    %c0_i32_0 = arith.constant 0 : i32
    return %arg0, %c0_i32 : i32, i32
  }
  func.func @transform_3(%arg0: i32) -> (i32, i32) {
    %c0_i32 = arith.constant 0 : i32
    %c0_i32_0 = arith.constant 0 : i32
    return %arg0, %c0_i32 : i32, i32
  }
  func.func @transform_4(%arg0: i32) -> (i32, i32) {
    %c0_i32 = arith.constant 0 : i32
    %c0_i32_0 = arith.constant 0 : i32
    return %arg0, %c0_i32 : i32, i32
  }
  func.func @transform_5(%arg0: i32) -> (i32, i32) {
    %c0_i32 = arith.constant 0 : i32
    %c0_i32_0 = arith.constant 0 : i32
    %c0_i32_1 = arith.constant 0 : i32
    return %c0_i32, %c0_i32_0 : i32, i32
  }
}

</mosaic_0001>

<bundles_post_ra>
// kernel: tpu_custom_call.1
= control target key start
LH: loop header
LB: loop body
LE: loop exit
PB: predicated region body
PF: predicated region fallthrough
CT: control target
= control target key end

     0   :  { %10 = vsyncpa [#allocation3], 0  ;;  %s247_s0 = inlined_call_operand.hbm [shape: s8[4,128], index: 0, kind: input, shape index: {}]   ;;  %s248_s1 = inlined_call_operand.vmem [shape: s8[4,128], index: 1, kind: input, shape index: {}]   ;;  %s249_s2 = inlined_call_operand.vmem [shape: bf16[4,128], index: 2, kind: input, shape index: {}]   ;;  %s250_s3 = inlined_call_operand.vmem [shape: bf16[4,128], index: 3, kind: input, shape index: {}]   ;;  %s251_s4 = inlined_call_operand.vmem [shape: s8[4,128], index: 4, kind: input, shape index: {}]   ;;  %s252_s5 = inlined_call_operand.hbm [shape: f32[1,1], index: 5, kind: output, shape index: {}]  }
   0x1   :  { %11 = vsyncpa [#allocation4], 0  ;;  %s175_s18 = smov [#allocation2]   ;;  %s139_s22 = scalar_lea.hbm %s247_s0, 16 }
   0x2   :  { %s18_s19 = sshll.u32 %s175_s18, 4  ;;  %p140_p0 = scmp.ne.s32.totalorder %s247_s0, %s139_s22  ;;  %s19_s19 = int_to_ptr.vmem [resolvable:$true] %s18_s19 }
   0x3   :  { %p143_p1 = scmp.lt.u32.totalorder %s139_s22, %s247_s0 }
   0x5   :  { %p145_p2 = pnand %p143_p1, %p140_p0 }
   0x7   :  { %148 = shalt.err (!%p145_p2)
}
   0x8   :  { %s149_s27 = scalar_lea.vmem %s19_s19, 16  ;;  %s153_s28 = scalar_lea.vmem %s19_s19, 32 }
   0x9   :  { %p150_p3 = scmp.ne.s32.totalorder %s19_s19, %s149_s27  ;;  %p154_p4 = scmp.lt.s32.totalorder %s19_s19, %s19_s19 }
   0xa   :  { %p155_p5 = scmp.lt.s32.totalorder %s153_s28, %s149_s27 }
   0xc   :  { %p156_p6 = por %p155_p5, %p154_p4 }
   0xe   :  { %p157_p7 = pnand %p156_p6, %p150_p3 }
  0x10   :  { %160 = shalt.err (!%p157_p7)
}
  0x11   :  { %21 = dma.hbm_to_vmem [thread:$0]  %s247_s0, 16, %s19_s19, [#allocation3]  }
  0x12   :  { %171 = dma.done.wait [#allocation3], 16  }
  0x13   :  { %172 = vsyncadd [#allocation3], 4294967280  ;;  %v39_v0 = vld [vmem:[#allocation2] sm:$0x1]  ;;  %v42_v1 = vld [vmem:[%s248_s1] sm:$0x1]  ;;  %v65_v8 = vlaneseq }
  0x14   :  { %v40_v2 = vunpack.c.0.s8 %v39_v0  ;;  %v43_v3 = vunpack.c.0.s8 %v42_v1  ;;  %vm48_vm0 = vcmask 1043456   ;;  %v58_v18 = vld [vmem:[%s251_s4] sm:$0x1]  ;;  %vm104_vm5 = vcmask 7168   ;;  %s161_s13 = scalar_lea.hbm %s252_s5, 16 }
  0x15   :  { %v66_v9 = vand.u32 127, %v65_v8  ;;  %v59_v19 = vunpack.c.0.s8 %v58_v18  ;;  %v52_v20 = vld [vmem:[%s250_s3] sm:$0x3]  ;;  %v97_v36 = vshrl.u32 %v65_v8, 7  ;;  %p162_p8 = scmp.ne.s32.totalorder %s252_s5, %s161_s13  ;;  %p165_p9 = scmp.lt.u32.totalorder %s161_s13, %s252_s5 }
  0x16   :  { %v41_v4 = vcvt.s32.f32 %v40_v2  ;;  %v44_v5 = vcvt.s32.f32 %v43_v3  ;;  %v53_v22 = vunpack.c.l.bf16 %v52_v20  ;;  %v50_v23 = vld [vmem:[%s249_s2] sm:$0x3] }
  0x17   :  { %v60_v21 = vcvt.s32.f32 %v59_v19  ;;  %v51_v26 = vunpack.c.l.bf16 %v50_v23  ;;  %v100_v37 = vrot.slane %v97_v36, 4  ;;  %p167_p10 = pnand %p165_p9, %p162_p8 }
  0x18   :  { %v46_v6 = vcombine.low %v44_v5, %v44_v5  ;;  %v55_v27 = vcombine.low %v53_v22, %v53_v22 }
  0x19   :  { %v62_v25 = vcombine.low %v60_v21, %v60_v21  ;;  %v101_v40 = vsel %vm48_vm0, %v97_v36, %v100_v37 }
  0x1a   :  { %v49_v7 = vsel %vm48_vm0, %v41_v4, %v46_v6  ;;  %v57_v33 = vsel %vm48_vm0, %v51_v26, %v55_v27  ;;  %vm102_vm4 = vcmp.lt.s32.totalorder %v101_v40, 4 }
  0x1b   :  { %67 = vmax.xlane.f32.xlu0 %v49_v7  ;;  %v64_v32 = vsel %vm48_vm0, %v60_v21, %v62_v25 }
  0xa8   :  { %v68_v10 = vpop.xlane.xlu0 %67 }
  0xa9   :  { %vm69_vm1 = vcmp.eq.f32.partialorder %v49_v7, %v68_v10 }
  0xaa   :  { %v70_v11 = vsel %vm69_vm1, %v66_v9, 128 }
  0xab   :  { %v72_v12 = vshra.s32 %v70_v11, 16  ;;  %v71_v14 = vand.u32 65535, %v70_v11 }
  0xad   :  { %v74_v13 = vcvt.s32.f32 %v72_v12  ;;  %v73_v16 = vcvt.s32.f32 %v71_v14 }
  0xaf   :  { %75 = vmin.xlane.f32.xlu0 %v74_v13 }
 0x13c   :  { %v76_v15 = vpop.xlane.xlu0 %75 }
 0x13d   :  { %vm77_vm2 = vcmp.eq.f32.partialorder %v74_v13, %v76_v15  ;;  %v82_v24 = vcvt.f32.s32 %v76_v15 }
 0x13e   :  { %v78_v17 = vsel %vm77_vm2, %v73_v16, inf }
 0x13f   :  { %79 = vmin.xlane.f32.xlu1 %v78_v17  ;;  %v83_v29 = vshll.u32 %v82_v24, 16 }
 0x1cc   :  { %v80_v28 = vpop.xlane.xlu1 %79 }
 0x1cd   :  { %v81_v30 = vcvt.f32.s32 %v80_v28 }
 0x1cf   :  { %v84_v31 = vadd.s32 %v83_v29, %v81_v30 }
 0x1d1   :  { %vm85_vm3 = vcmp.eq.s32.totalorder %v66_v9, %v84_v31 }
 0x1d2   :  { %v89_v34 = vsel %vm85_vm3, %v64_v32, 0.0  ;;  %v86_v35 = vsel %vm85_vm3, %v57_v33, 0.0 }
 0x1d3   :  { %90 = vadd.xlane.f32.xlu1 %v89_v34  ;;  %87 = vadd.xlane.f32.xlu0 %v86_v35 }
 0x260   :  { %v91_v38 = vpop.xlane.xlu1 %90  ;;  %v88_v42 = vpop.xlane.xlu0 %87 }
 0x261   :  { %v92_v39 = vsub.f32 1.0, %v91_v38 }
 0x263   :  { %v93_v41 = vmul.f32 1e+30, %v92_v39 }
 0x265   :  { %v94_v43 = vsub.f32 %v88_v42, %v93_v41 }
 0x267   :  { %v103_v44 = vsel %vm102_vm4, %v94_v43, 0.0 }
 0x268   :  { %v105_v45 = vsel %vm104_vm5, %v103_v44, 0.0 }
 0x269   :  { %106 = vadd.xlane.f32.xlu1 %v105_v45 }
 0x2f6   :  { %v107_v46 = vpop.xlane.xlu1 %106 }
 0x2f7   :  { %v108_v47 = vrot.slane %v107_v46, 4 }
 0x2f9   :  { %v109_v48 = vadd.f32 %v108_v47, %v107_v46 }
 0x2fb   :  { %v110_v49 = vrot.slane %v109_v48, 2 }
 0x2fd   :  { %v111_v50 = vadd.f32 %v110_v49, %v109_v48 }
 0x2ff   :  { %v112_v51 = vrot.slane %v111_v50, 1 }
 0x301   :  { %v113_v52 = vadd.f32 %v112_v51, %v111_v50 }
 0x303   :  { %134 = vpush %v113_v52 }
 0x334   :  { %s135_s2 = spop %134 }
 0x335   :  { %s116_s3 = smul.f32 -0.25, %s135_s2 }
 0x337   :  { %119 = sst [smem:[#allocation5]] %s116_s3 }
 0x338   :  { %170 = shalt.err (!%p167_p10)
}
 0x339   :  { %s176_s18 = smov [#allocation5]  }
 0x33a   :  { %127 = dma.smem_to_hbm %s176_s18, 16, %s252_s5, [#allocation4]  }
 0x33b   :  { %173 = dma.done.wait [#allocation4], 16  }
 0x33c   :  { %174 = vsyncadd [#allocation4], 4294967280 }
 0x33d   :  { %131 = sfence }
 0x33e   :  { %132 = vsyncpa [#allocation3], 1 }
 0x33f   :  { %133 = vsyncpa [#allocation4], 1 }

</bundles_post_ra>
